<compile_context>
chip_gen: v7x
topology: tpu7x:2x2x1
jax: 0.10.0
libtpu: 0.0.40
codegen_flags: <defaults>
</compile_context>

<pallas_src>
import jax
import jax.numpy as jnp
from jax.experimental import pallas as pl
from jax.experimental.pallas import tpu as pltpu

BN_EPS = 1e-5
LANE = 128   # lane alignment; node axis is also padded to 128 (adj's lane dim is n_pad)


def _round_up(v, m):
    return ((v + m - 1) // m) * m


def make_incep_kernel(num_b, out_dim, slot_w, n_pad, n_real, training, use_dropout):
    """Fused inception-block kernel; branch structure / shapes are baked into the trace."""
    inv_n = 1.0 / float(n_real)

    def kernel(adj_ref, x_ref,                      # bf16 graph data (VMEM-resident)
               w0_ref, b0_ref, g0_ref, be0_ref,     # level-0 params (lane-packed branches)
               wd_ref, bd_ref, gd_ref, bed_ref,     # deeper levels (block-diagonal packed)
               *rest):                              # [drop_ref] (train), o_ref
        if use_dropout:
            drop_ref, o_ref = rest
        else:
            (o_ref,) = rest

        adj = adj_ref[...]   # loaded once, reused by every level's adjacency matmul
        cols = jax.lax.broadcasted_iota(jnp.int32, (n_pad, slot_w), 1)

        if training:
            # Alignment-padding rows must not skew BN batch statistics.
            rows = jax.lax.broadcasted_iota(jnp.int32, (n_pad, slot_w), 0)
            row_mask = (rows < n_real).astype(jnp.float32)

        def bn_relu_drop(h, gamma, beta, level):
            if training:
                # Single-pass batch stats over the n_real real rows (biased, like PyTorch).
                hm = h * row_mask
                mean = jnp.sum(hm, axis=0, keepdims=True) * inv_n
                ex2 = jnp.sum(hm * h, axis=0, keepdims=True) * inv_n
                var = jnp.maximum(ex2 - mean * mean, 0.0)
                scale = gamma * jax.lax.rsqrt(var + BN_EPS)   # gamma already has 1/(1-p)
                shift = beta - mean * scale
            else:
                # Eval: running stats (and nothing else) folded into (scale, shift) on host.
                scale, shift = gamma, beta
            out = jnp.maximum(h * scale + shift, 0.0)          # ReLU
            if use_dropout:
                out = out * drop_ref[level]                    # {0,1} mask; 1/(1-p) folded
            return out

        # ---- Level 0: adj @ X computed once, then one lane-packed matmul for all branches.
        ax = jnp.dot(adj, x_ref[...], preferred_element_type=jnp.float32)
        h = jnp.dot(ax.astype(jnp.bfloat16), w0_ref[...],
                    preferred_element_type=jnp.float32) + b0_ref[...]
        h = bn_relu_drop(h, g0_ref[...], be0_ref[...], 0)
        acc = h   # branch 0's columns are final; deeper branches get overwritten below

        # ---- Deeper levels: one block-diagonal H@W and one adj@HW per level.
        for L in range(1, num_b):
            hw = jnp.dot(h.astype(jnp.bfloat16), wd_ref[L - 1],
                         preferred_element_type=jnp.float32)
            h = jnp.dot(adj, hw.astype(jnp.bfloat16),
                        preferred_element_type=jnp.float32) + bd_ref[L - 1]
            h = bn_relu_drop(h, gd_ref[L - 1], bed_ref[L - 1], L)
            # Branch L finishes at level L; take its (and later branches') columns from h.
            acc = jnp.where(cols >= L * out_dim, h, acc)

        o_ref[...] = acc   # single lane-dense store

    return kernel


def _fold_bn(gamma, beta, rm, rv, training):
    """Train: pass gamma/beta raw. Eval: fold running stats into an affine (scale, shift)."""
    if training:
        return gamma, beta
    scale = gamma / jnp.sqrt(rv + BN_EPS)
    return scale, beta - rm * scale


def incep_gcn_block_forward(x, adj_norm, params, *, dropout_p=0.5, training=False, seed=0):
    """IncepGCNBlock.forward: concat([input, branch_1(x), ..., branch_B(x)], axis=1)."""
    n, in_dim = x.shape
    num_b = len(params)
    out_dim = params[0][0][0].shape[1]

    in_pad = _round_up(in_dim, LANE)
    slot_w = _round_up(num_b * out_dim, LANE)   # ALL branches share one packed lane slot
    n_pad = _round_up(n, LANE)                  # adj's lane dim is n_pad -> pad to 128

    use_dropout = bool(training) and dropout_p > 0.0
    keep_scale = 1.0 / (1.0 - dropout_p) if use_dropout else 1.0

    # Graph data: zero-pad to aligned shapes; cast to bf16 for the MXU (f32 accumulation).
    x_p = jnp.zeros((n_pad, in_pad), jnp.float32).at[:n, :in_dim].set(x)
    adj_p = jnp.zeros((n_pad, n_pad), jnp.float32).at[:n, :n].set(adj_norm)

    # Level-0 params: branch-entry weights packed tightly along lanes (branch i at i*out_dim).
    w0 = jnp.zeros((in_pad, slot_w), jnp.float32)
    b0 = jnp.zeros((1, slot_w), jnp.float32)
    g0 = jnp.zeros((1, slot_w), jnp.float32)
    be0 = jnp.zeros((1, slot_w), jnp.float32)
    for i in range(num_b):
        w, b, gamma, beta, rm, rv = params[i][0]
        sc, sh = _fold_bn(gamma, beta, rm, rv, training)
        c = i * out_dim
        w0 = w0.at[:in_dim, c:c + out_dim].set(w)
        b0 = b0.at[:, c:c + out_dim].set(b)
        g0 = g0.at[:, c:c + out_dim].set(sc * keep_scale)    # fold dropout 1/(1-p)
        be0 = be0.at[:, c:c + out_dim].set(sh * keep_scale)

    # Deeper levels: block-diagonal weights per level; inactive-branch blocks stay zero.
    ndl = max(num_b - 1, 1)
    wd = jnp.zeros((ndl, slot_w, slot_w), jnp.float32)
    bd = jnp.zeros((ndl, 1, slot_w), jnp.float32)
    gd = jnp.zeros((ndl, 1, slot_w), jnp.float32)
    bed = jnp.zeros((ndl, 1, slot_w), jnp.float32)
    for L in range(1, num_b):
        for i in range(L, num_b):   # branches with a block at level L
            w, b, gamma, beta, rm, rv = params[i][L]
            sc, sh = _fold_bn(gamma, beta, rm, rv, training)
            c = i * out_dim
            wd = wd.at[L - 1, c:c + out_dim, c:c + out_dim].set(w)
            bd = bd.at[L - 1, :, c:c + out_dim].set(b)
            gd = gd.at[L - 1, :, c:c + out_dim].set(sc * keep_scale)
            bed = bed.at[L - 1, :, c:c + out_dim].set(sh * keep_scale)

    extra_inputs = []
    if use_dropout:
        # Host-drawn {0,1} keep masks (one [n_pad, slot_w] draw per level; branches occupy
        # disjoint columns so their masks are independent, matching per-block F.dropout).
        keys = jax.random.split(jax.random.PRNGKey(seed), num_b)
        drop = jnp.stack([
            jax.random.bernoulli(keys[L], 1.0 - dropout_p, (n_pad, slot_w)).astype(jnp.float32)
            for L in range(num_b)])
        extra_inputs.append(drop)

    # VMEM budget: resident bf16 inputs + f32 params/masks + live f32 intermediates.
    bf16_in = 2 * (n_pad * n_pad + n_pad * in_pad + in_pad * slot_w + ndl * slot_w * slot_w)
    f32_in = 4 * ((4 + 4 * ndl) * slot_w + (num_b * n_pad * slot_w if use_dropout else 0))
    f32_work = 4 * (6 * n_pad * slot_w + n_pad * in_pad + n_pad * slot_w)  # h/hw/acc/masks/out
    resident_bytes = bf16_in + f32_in + f32_work
    # TODO(synk): large-N path (row-tiled 'parallel' grid + two-pass BN) not implemented.
    assert resident_bytes < 40 * 1024 * 1024, "switch to a row-tiled grid for large N"
    vmem_limit = int(min(max(2 * resident_bytes, 32 * 1024 * 1024), 96 * 1024 * 1024))

    kernel = make_incep_kernel(num_b, out_dim, slot_w, n_pad, n, training, use_dropout)
    out = pl.pallas_call(
        kernel,
        out_shape=jax.ShapeDtypeStruct((n_pad, slot_w), jnp.float32),
        compiler_params=pltpu.CompilerParams(vmem_limit_bytes=vmem_limit),
    )(
        adj_p.astype(jnp.bfloat16), x_p.astype(jnp.bfloat16),
        w0.astype(jnp.bfloat16), b0, g0, be0,
        wd.astype(jnp.bfloat16), bd, gd, bed,
        *extra_inputs,
    )

    # Lane-packed kernel output -> exact PyTorch concat layout (layout glue only).
    branch_outs = [out[:n, i * out_dim:(i + 1) * out_dim] for i in range(num_b)]
    return jnp.concatenate([x] + branch_outs, axis=1)


def reference_forward_eval(x, adj_norm, params):
    """Pure-JAX eval-mode reference (running-stat BN, identity dropout)."""
    outs = [x]
    for branch in params:
        h = x
        for (w, b, gamma, beta, rm, rv) in branch:
            h = adj_norm @ (h @ w) + b
            scale = gamma / jnp.sqrt(rv + BN_EPS)
            h = h * scale + (beta - rm * scale)
            h = jnp.maximum(h, 0.0)
        outs.append(h)
    return jnp.concatenate(outs, axis=1)


def gcn_normalize(adj, add_self_loops=True):
    """Glue: dense GCN symmetric normalization  D^-1/2 (A [+ I]) D^-1/2."""
    n = adj.shape[0]
    a = adj + jnp.eye(n, dtype=adj.dtype) if add_self_loops else adj
    deg = jnp.sum(a, axis=1)
    dinv = jnp.where(deg > 0, jax.lax.rsqrt(deg), 0.0)
    return a * dinv[:, None] * dinv[None, :]


def init_incep_gcn_params(key, num_branches, in_dim, out_dim):
    """branch i has (i+1) GCNBlocks; each block = (W, b, gamma, beta, running_mean, running_var)."""
    params = []
    for i in range(num_branches):
        branch = []
        for j in range(i + 1):
            curr_in = in_dim if j == 0 else out_dim
            key, kw = jax.random.split(key)
            limit = (6.0 / (curr_in + out_dim)) ** 0.5
            w = jax.random.uniform(kw, (curr_in, out_dim), jnp.float32, -limit, limit)
            b = jnp.zeros((1, out_dim), jnp.float32)
            gamma = jnp.ones((1, out_dim), jnp.float32)
            beta = jnp.zeros((1, out_dim), jnp.float32)
            rm = jnp.zeros((1, out_dim), jnp.float32)     # BN running_mean
            rv = jnp.ones((1, out_dim), jnp.float32)      # BN running_var
            branch.append((w, b, gamma, beta, rm, rv))
        params.append(branch)
    return params


if __name__ == "__main__":
    # N=16 nodes, in_dim=8, out_dim=16, 3 branches, self_loops=True, dropout=0.5
    N, IN_DIM, OUT_DIM, NUM_BRANCHES = 16, 8, 16, 3

    key = jax.random.PRNGKey(0)
    kx, kadj, kp = jax.random.split(key, 3)

    x = jax.random.normal(kx, (N, IN_DIM), dtype=jnp.float32)

    # Random symmetric binary adjacency (no raw self loops).
    raw = jax.random.uniform(kadj, (N, N))
    adj = (raw + raw.T > 1.0).astype(jnp.float32)
    adj = adj * (1.0 - jnp.eye(N, dtype=jnp.float32))
    adj_norm = gcn_normalize(adj, add_self_loops=True)

    params = init_incep_gcn_params(kp, NUM_BRANCHES, IN_DIM, OUT_DIM)
    expected_dim = IN_DIM + NUM_BRANCHES * OUT_DIM   # block_out_dim

    # eval() semantics: running-stat BatchNorm + identity dropout (deterministic).
    out_eval = jax.block_until_ready(
        incep_gcn_block_forward(x, adj_norm, params, dropout_p=0.5, training=False))
    assert out_eval.shape == (N, expected_dim), out_eval.shape
    assert bool(jnp.all(jnp.isfinite(out_eval)))
    ref_eval = reference_forward_eval(x, adj_norm, params)
    max_err = float(jnp.max(jnp.abs(out_eval - ref_eval)))
    assert max_err < 0.1, f"eval mismatch vs pure-JAX reference: max_err={max_err}"

    # train() semantics: batch-stat BatchNorm + stochastic dropout (host-drawn masks).
    out_train = jax.block_until_ready(
        incep_gcn_block_forward(x, adj_norm, params, dropout_p=0.5, training=True, seed=1234))
    assert out_train.shape == (N, expected_dim), out_train.shape
    assert bool(jnp.all(jnp.isfinite(out_train)))

    print("KERNEL_OK")
</pallas_src>

<mosaic_0001>
module attributes {stable_mosaic.version = 11 : i64} {
  func.func @kernel(%arg0: memref<128x128xbf16, #tpu.memory_space<vmem>>, %arg1: memref<128x128xbf16, #tpu.memory_space<vmem>>, %arg2: memref<128x128xbf16, #tpu.memory_space<vmem>>, %arg3: memref<1x128xf32, #tpu.memory_space<vmem>>, %arg4: memref<1x128xf32, #tpu.memory_space<vmem>>, %arg5: memref<1x128xf32, #tpu.memory_space<vmem>>, %arg6: memref<2x128x128xbf16, #tpu.memory_space<vmem>>, %arg7: memref<2x1x128xf32, #tpu.memory_space<vmem>>, %arg8: memref<2x1x128xf32, #tpu.memory_space<vmem>>, %arg9: memref<2x1x128xf32, #tpu.memory_space<vmem>>, %arg10: memref<128x128xf32, #tpu.memory_space<vmem>>) attributes {dimension_semantics = [], scalar_prefetch = 0 : i64, scratch_operands = 0 : i64, tpu.core_type = #tpu.core_type<tc>} {
    %c0 = arith.constant 0 : index
    %c0_0 = arith.constant 0 : index
    %0 = vector.load %arg0[%c0, %c0_0] : memref<128x128xbf16, #tpu.memory_space<vmem>>, vector<128x128xbf16>
    %1 = tpu.iota {dimensions = array<i32: 1>} : vector<128x128xi32>
    %c0_1 = arith.constant 0 : index
    %c0_2 = arith.constant 0 : index
    %2 = vector.load %arg1[%c0_1, %c0_2] : memref<128x128xbf16, #tpu.memory_space<vmem>>, vector<128x128xbf16>
    %cst = arith.constant dense<0.000000e+00> : vector<128x128xf32>
    %3 = tpu.matmul %0, %2, %cst {dimension_numbers = #tpu.dot_dimension_numbers<[1], [0], [0], [1], [0, 0, 1, 1], [], []>} : vector<128x128xbf16>, vector<128x128xbf16>, vector<128x128xf32> -> vector<128x128xf32>
    %4 = arith.truncf %3 : vector<128x128xf32> to vector<128x128xbf16>
    %c0_3 = arith.constant 0 : index
    %c0_4 = arith.constant 0 : index
    %5 = vector.load %arg2[%c0_3, %c0_4] : memref<128x128xbf16, #tpu.memory_space<vmem>>, vector<128x128xbf16>
    %cst_5 = arith.constant dense<0.000000e+00> : vector<128x128xf32>
    %6 = tpu.matmul %4, %5, %cst_5 {dimension_numbers = #tpu.dot_dimension_numbers<[1], [0], [0], [1], [0, 0, 1, 1], [], []>} : vector<128x128xbf16>, vector<128x128xbf16>, vector<128x128xf32> -> vector<128x128xf32>
    %c0_6 = arith.constant 0 : index
    %c0_7 = arith.constant 0 : index
    %7 = vector.load %arg3[%c0_6, %c0_7] : memref<1x128xf32, #tpu.memory_space<vmem>>, vector<1x128xf32>
    %8 = vector.broadcast %7 : vector<1x128xf32> to vector<128x128xf32>
    %9 = arith.addf %6, %8 : vector<128x128xf32>
    %c0_8 = arith.constant 0 : index
    %c0_9 = arith.constant 0 : index
    %10 = vector.load %arg4[%c0_8, %c0_9] : memref<1x128xf32, #tpu.memory_space<vmem>>, vector<1x128xf32>
    %c0_10 = arith.constant 0 : index
    %c0_11 = arith.constant 0 : index
    %11 = vector.load %arg5[%c0_10, %c0_11] : memref<1x128xf32, #tpu.memory_space<vmem>>, vector<1x128xf32>
    %12 = vector.broadcast %10 : vector<1x128xf32> to vector<128x128xf32>
    %13 = arith.mulf %9, %12 : vector<128x128xf32>
    %14 = vector.broadcast %11 : vector<1x128xf32> to vector<128x128xf32>
    %15 = arith.addf %13, %14 : vector<128x128xf32>
    %cst_12 = arith.constant 0.000000e+00 : f32
    %16 = vector.broadcast %cst_12 : f32 to vector<128x128xf32>
    %17 = arith.maximumf %15, %16 : vector<128x128xf32>
    %18 = arith.truncf %17 : vector<128x128xf32> to vector<128x128xbf16>
    %c0_13 = arith.constant 0 : index
    %c0_14 = arith.constant 0 : index
    %c0_15 = arith.constant 0 : index
    %19 = vector.load %arg6[%c0_13, %c0_14, %c0_15] : memref<2x128x128xbf16, #tpu.memory_space<vmem>>, vector<1x128x128xbf16>
    %20 = vector.shape_cast %19 : vector<1x128x128xbf16> to vector<128x128xbf16>
    %cst_16 = arith.constant dense<0.000000e+00> : vector<128x128xf32>
    %21 = tpu.matmul %18, %20, %cst_16 {dimension_numbers = #tpu.dot_dimension_numbers<[1], [0], [0], [1], [0, 0, 1, 1], [], []>} : vector<128x128xbf16>, vector<128x128xbf16>, vector<128x128xf32> -> vector<128x128xf32>
    %22 = arith.truncf %21 : vector<128x128xf32> to vector<128x128xbf16>
    %cst_17 = arith.constant dense<0.000000e+00> : vector<128x128xf32>
    %23 = tpu.matmul %0, %22, %cst_17 {dimension_numbers = #tpu.dot_dimension_numbers<[1], [0], [0], [1], [0, 0, 1, 1], [], []>} : vector<128x128xbf16>, vector<128x128xbf16>, vector<128x128xf32> -> vector<128x128xf32>
    %c0_18 = arith.constant 0 : index
    %c0_19 = arith.constant 0 : index
    %c0_20 = arith.constant 0 : index
    %24 = vector.load %arg7[%c0_18, %c0_19, %c0_20] : memref<2x1x128xf32, #tpu.memory_space<vmem>>, vector<1x1x128xf32>
    %25 = vector.shape_cast %24 : vector<1x1x128xf32> to vector<1x128xf32>
    %26 = vector.broadcast %25 : vector<1x128xf32> to vector<128x128xf32>
    %27 = arith.addf %23, %26 : vector<128x128xf32>
    %c0_21 = arith.constant 0 : index
    %c0_22 = arith.constant 0 : index
    %c0_23 = arith.constant 0 : index
    %28 = vector.load %arg8[%c0_21, %c0_22, %c0_23] : memref<2x1x128xf32, #tpu.memory_space<vmem>>, vector<1x1x128xf32>
    %29 = vector.shape_cast %28 : vector<1x1x128xf32> to vector<1x128xf32>
    %c0_24 = arith.constant 0 : index
    %c0_25 = arith.constant 0 : index
    %c0_26 = arith.constant 0 : index
    %30 = vector.load %arg9[%c0_24, %c0_25, %c0_26] : memref<2x1x128xf32, #tpu.memory_space<vmem>>, vector<1x1x128xf32>
    %31 = vector.shape_cast %30 : vector<1x1x128xf32> to vector<1x128xf32>
    %32 = vector.broadcast %29 : vector<1x128xf32> to vector<128x128xf32>
    %33 = arith.mulf %27, %32 : vector<128x128xf32>
    %34 = vector.broadcast %31 : vector<1x128xf32> to vector<128x128xf32>
    %35 = arith.addf %33, %34 : vector<128x128xf32>
    %cst_27 = arith.constant 0.000000e+00 : f32
    %36 = vector.broadcast %cst_27 : f32 to vector<128x128xf32>
    %37 = arith.maximumf %35, %36 : vector<128x128xf32>
    %c16_i32 = arith.constant 16 : i32
    %38 = vector.broadcast %c16_i32 : i32 to vector<128x128xi32>
    %39 = arith.cmpi sge, %1, %38 : vector<128x128xi32>
    %40 = arith.select %39, %37, %17 : vector<128x128xi1>, vector<128x128xf32>
    %41 = arith.truncf %37 : vector<128x128xf32> to vector<128x128xbf16>
    %c1 = arith.constant 1 : index
    %c0_28 = arith.constant 0 : index
    %c0_29 = arith.constant 0 : index
    %42 = vector.load %arg6[%c1, %c0_28, %c0_29] : memref<2x128x128xbf16, #tpu.memory_space<vmem>>, vector<1x128x128xbf16>
    %43 = vector.shape_cast %42 : vector<1x128x128xbf16> to vector<128x128xbf16>
    %cst_30 = arith.constant dense<0.000000e+00> : vector<128x128xf32>
    %44 = tpu.matmul %41, %43, %cst_30 {dimension_numbers = #tpu.dot_dimension_numbers<[1], [0], [0], [1], [0, 0, 1, 1], [], []>} : vector<128x128xbf16>, vector<128x128xbf16>, vector<128x128xf32> -> vector<128x128xf32>
    %45 = arith.truncf %44 : vector<128x128xf32> to vector<128x128xbf16>
    %cst_31 = arith.constant dense<0.000000e+00> : vector<128x128xf32>
    %46 = tpu.matmul %0, %45, %cst_31 {dimension_numbers = #tpu.dot_dimension_numbers<[1], [0], [0], [1], [0, 0, 1, 1], [], []>} : vector<128x128xbf16>, vector<128x128xbf16>, vector<128x128xf32> -> vector<128x128xf32>
    %c1_32 = arith.constant 1 : index
    %c0_33 = arith.constant 0 : index
    %c0_34 = arith.constant 0 : index
    %47 = vector.load %arg7[%c1_32, %c0_33, %c0_34] : memref<2x1x128xf32, #tpu.memory_space<vmem>>, vector<1x1x128xf32>
    %48 = vector.shape_cast %47 : vector<1x1x128xf32> to vector<1x128xf32>
    %49 = vector.broadcast %48 : vector<1x128xf32> to vector<128x128xf32>
    %50 = arith.addf %46, %49 : vector<128x128xf32>
    %c1_35 = arith.constant 1 : index
    %c0_36 = arith.constant 0 : index
    %c0_37 = arith.constant 0 : index
    %51 = vector.load %arg8[%c1_35, %c0_36, %c0_37] : memref<2x1x128xf32, #tpu.memory_space<vmem>>, vector<1x1x128xf32>
    %52 = vector.shape_cast %51 : vector<1x1x128xf32> to vector<1x128xf32>
    %c1_38 = arith.constant 1 : index
    %c0_39 = arith.constant 0 : index
    %c0_40 = arith.constant 0 : index
    %53 = vector.load %arg9[%c1_38, %c0_39, %c0_40] : memref<2x1x128xf32, #tpu.memory_space<vmem>>, vector<1x1x128xf32>
    %54 = vector.shape_cast %53 : vector<1x1x128xf32> to vector<1x128xf32>
    %55 = vector.broadcast %52 : vector<1x128xf32> to vector<128x128xf32>
    %56 = arith.mulf %50, %55 : vector<128x128xf32>
    %57 = vector.broadcast %54 : vector<1x128xf32> to vector<128x128xf32>
    %58 = arith.addf %56, %57 : vector<128x128xf32>
    %cst_41 = arith.constant 0.000000e+00 : f32
    %59 = vector.broadcast %cst_41 : f32 to vector<128x128xf32>
    %60 = arith.maximumf %58, %59 : vector<128x128xf32>
    %c32_i32 = arith.constant 32 : i32
    %61 = vector.broadcast %c32_i32 : i32 to vector<128x128xi32>
    %62 = arith.cmpi sge, %1, %61 : vector<128x128xi32>
    %63 = arith.select %62, %60, %40 : vector<128x128xi1>, vector<128x128xf32>
    %c0_42 = arith.constant 0 : index
    %c0_43 = arith.constant 0 : index
    %64 = vector.load %arg10[%c0_42, %c0_43] : memref<128x128xf32, #tpu.memory_space<vmem>>, vector<128x128xf32>
    tpu.vector_store %arg10[%c0_42, %c0_43], %63 {strides = array<i32>} : memref<128x128xf32, #tpu.memory_space<vmem>>, vector<128x128xf32>,
    return
  }
}

</mosaic_0001>

<bundles_post_ra>
// kernel: tpu_custom_call.1
= control target key start
LH: loop header
LB: loop body
LE: loop exit
PB: predicated region body
PF: predicated region fallthrough
CT: control target
= control target key end

     0   :  { %15 = vsyncpa [#allocation3], 0  ;;  %s2494_s0 = inlined_call_operand.hbm [shape: bf16[128,128], index: 0, kind: input, shape index: {}]   ;;  %s2495_s1 = inlined_call_operand.hbm [shape: bf16[128,128], index: 1, kind: input, shape index: {}]   ;;  %s2496_s2 = inlined_call_operand.hbm [shape: bf16[128,128], index: 2, kind: input, shape index: {}]   ;;  %s2497_s3 = inlined_call_operand.vmem [shape: f32[1,128], index: 3, kind: input, shape index: {}]   ;;  %s2498_s4 = inlined_call_operand.vmem [shape: f32[1,128], index: 4, kind: input, shape index: {}]   ;;  %s2499_s5 = inlined_call_operand.vmem [shape: f32[1,128], index: 5, kind: input, shape index: {}]   ;;  %s2500_s6 = inlined_call_operand.hbm [shape: bf16[2,128,128], index: 6, kind: input, shape index: {}]   ;;  %s2501_s7 = inlined_call_operand.vmem [shape: f32[2,1,128], index: 7, kind: input, shape index: {}]   ;;  %s2502_s8 = inlined_call_operand.vmem [shape: f32[2,1,128], index: 8, kind: input, shape index: {}]   ;;  %s2503_s9 = inlined_call_operand.vmem [shape: f32[2,1,128], index: 9, kind: input, shape index: {}]   ;;  %s2504_s10 = inlined_call_operand.hbm [shape: f32[128,128], index: 10, kind: output, shape index: {}]  }
   0x1   :  { %16 = vsyncpa [#allocation6], 0 }
   0x2   :  { %17 = vsyncpa [#allocation9], 0 }
   0x3   :  { %18 = vsyncpa [#allocation4], 0  ;;  %s1823_s13 = smov [#allocation5]   ;;  %s1824_s15 = smov [#allocation2]  }
   0x4   :  { %s36_s14 = sshll.u32 %s1823_s13, 4  ;;  %s24_s16 = sshll.u32 %s1824_s15, 4  ;;  %s37_s14 = int_to_ptr.vmem [resolvable:$true] %s36_s14  ;;  %s1887_s16 = int_to_ptr.vmem [resolvable:$true] %s24_s16 }
   0x5   :  { %s1705_s19 = scalar_lea.hbm %s2495_s1, 1024 }
   0x6   :  { %p1706_p0 = scmp.ne.s32.totalorder %s2495_s1, %s1705_s19  ;;  %p1709_p1 = scmp.lt.u32.totalorder %s1705_s19, %s2495_s1 }
   0x8   :  { %p1711_p2 = pnand %p1709_p1, %p1706_p0 }
   0xa   :  { %1714 = shalt.err (!%p1711_p2)
}
   0xb   :  { %s1715_s24 = scalar_lea.vmem %s37_s14, 1024  ;;  %p1720_p4 = scmp.lt.s32.totalorder %s37_s14, %s37_s14 }
   0xc   :  { %p1716_p3 = scmp.ne.s32.totalorder %s37_s14, %s1715_s24  ;;  %p1721_p5 = scmp.lt.s32.totalorder %s1715_s24, %s1715_s24 }
   0xe   :  { %p1722_p6 = por %p1721_p5, %p1720_p4 }
  0x10   :  { %p1723_p7 = pnand %p1722_p6, %p1716_p3 }
  0x12   :  { %1726 = shalt.err (!%p1723_p7)
}
  0x13   :  { %s1825_s25 = smov 64   ;;  %s1826_s26 = smov 4  }
  0x14   :  { %42 = dma.hbm_to_vmem [thread:$0]  %s2495_s1, 1024, %s37_s14, [#allocation6], %s1825_s25, %s1825_s25, %s1826_s26  }
  0x15   :  { %s1727_s11 = scalar_lea.hbm %s2494_s0, 1024 }
  0x16   :  { %p1728_p8 = scmp.ne.s32.totalorder %s2494_s0, %s1727_s11  ;;  %p1731_p9 = scmp.lt.u32.totalorder %s1727_s11, %s2494_s0 }
  0x18   :  { %p1733_p10 = pnand %p1731_p9, %p1728_p8 }
  0x1a   :  { %1736 = shalt.err (!%p1733_p10)
}
  0x1b   :  { %s1737_s18 = scalar_lea.vmem %s1887_s16, 1024  ;;  %p1742_p12 = scmp.lt.s32.totalorder %s1887_s16, %s1887_s16 }
  0x1c   :  { %p1738_p11 = scmp.ne.s32.totalorder %s1887_s16, %s1737_s18  ;;  %p1743_p13 = scmp.lt.s32.totalorder %s1737_s18, %s1737_s18 }
  0x1e   :  { %p1744_p0 = por %p1743_p13, %p1742_p12 }
  0x20   :  { %p1745_p1 = pnand %p1744_p0, %p1738_p11 }
  0x22   :  { %1748 = shalt.err (!%p1745_p1)
}
  0x23   :  { %30 = dma.hbm_to_vmem [thread:$0]  %s2494_s0, 1024, %s1887_s16, [#allocation3], %s1825_s25, %s1825_s25, %s1826_s26  }
  0x24   :  { %s1827_s19 = smov [#allocation7]   ;;  %s1828_s21 = smov [#allocation8]  }
  0x25   :  { %s48_s20 = sshll.u32 %s1827_s19, 4  ;;  %s66_s22 = sshll.u32 %s1828_s21, 4  ;;  %s49_s20 = int_to_ptr.vmem [resolvable:$true] %s48_s20  ;;  %s1924_s22 = int_to_ptr.vmem [resolvable:$true] %s66_s22 }
  0x26   :  { %s1749_s27 = scalar_lea.hbm %s2496_s2, 1024 }
  0x27   :  { %p1750_p2 = scmp.ne.s32.totalorder %s2496_s2, %s1749_s27  ;;  %p1753_p3 = scmp.lt.u32.totalorder %s1749_s27, %s2496_s2 }
  0x29   :  { %p1755_p4 = pnand %p1753_p3, %p1750_p2 }
  0x2b   :  { %1758 = shalt.err (!%p1755_p4)
}
  0x2c   :  { %s1759_s0 = scalar_lea.vmem %s49_s20, 1024  ;;  %p1764_p6 = scmp.lt.s32.totalorder %s49_s20, %s49_s20 }
  0x2d   :  { %p1760_p5 = scmp.ne.s32.totalorder %s49_s20, %s1759_s0  ;;  %p1765_p7 = scmp.lt.s32.totalorder %s1759_s0, %s1759_s0 }
  0x2f   :  { %p1766_p8 = por %p1765_p7, %p1764_p6 }
  0x31   :  { %p1767_p9 = pnand %p1766_p8, %p1760_p5 }
  0x33   :  { %1770 = shalt.err (!%p1767_p9)
}
  0x34   :  { %54 = dma.hbm_to_vmem [thread:$0]  %s2496_s2, 1024, %s49_s20, [#allocation6], %s1825_s25, %s1825_s25, %s1826_s26  }
  0x35   :  { %s1771_s17 = scalar_lea.hbm %s2500_s6, 2048 }
  0x36   :  { %p1772_p10 = scmp.ne.s32.totalorder %s2500_s6, %s1771_s17  ;;  %p1775_p11 = scmp.lt.u32.totalorder %s1771_s17, %s2500_s6 }
  0x38   :  { %p1777_p12 = pnand %p1775_p11, %p1772_p10 }
  0x3a   :  { %1780 = shalt.err (!%p1777_p12)
}
  0x3b   :  { %s1781_s21 = scalar_lea.vmem %s1924_s22, 2048  ;;  %p1786_p0 = scmp.lt.s32.totalorder %s1924_s22, %s1924_s22 }
  0x3c   :  { %p1782_p13 = scmp.ne.s32.totalorder %s1924_s22, %s1781_s21  ;;  %p1787_p1 = scmp.lt.s32.totalorder %s1781_s21, %s1781_s21 }
  0x3e   :  { %p1788_p2 = por %p1787_p1, %p1786_p0 }
  0x40   :  { %p1789_p3 = pnand %p1788_p2, %p1782_p13 }
  0x42   :  { %1792 = shalt.err (!%p1789_p3)
}
  0x43   :  { %72 = dma.hbm_to_vmem [thread:$0]  %s2500_s6, 2048, %s1924_s22, [#allocation9], %s1825_s25, %s1825_s25, %s1826_s26  }
  0x44   :  { %1815 = dma.done.wait [#allocation3], 1024  }
  0x45   :  { %1816 = vsyncadd [#allocation3], 4294966272 }
  0x46   :  { %1817 = dma.done.wait [#allocation6], 2048  }
  0x47   :  { %1818 = vsyncadd [#allocation6], 4294965248 }
  0x48   :  { %1819 = dma.done.wait [#allocation9], 2048  }
  0x49   :  { %1820 = vsyncadd [#allocation9], 4294965248  ;;  %v1665_v0 = vld [vmem:[#allocation5] sm:$0xff]   ;;  %v1666_v1 = vld [vmem:[#allocation5 + $0x8] sm:$0xff]  }
  0x4a   :  { %1464 = vmatprep.subr.bf16.mxu0 %v1665_v0  ;;  %v1667_v2 = vld [vmem:[#allocation5 + $0x10] sm:$0xff]   ;;  %v1668_v3 = vld [vmem:[#allocation5 + $0x18] sm:$0xff]   ;;  %v1961_v4 = vld [vmem:[#allocation2] sm:$0xff]  }
  0x4b   :  { %1465 = vmatpush3.bf16.msra.mxu0 %v1665_v0  ;;  %1480 = vmatprep.mubr.bf16.mxu0 %v1961_v4  ;;  %v1669_v5 = vld [vmem:[#allocation5 + $0x20] sm:$0xff]   ;;  %v1670_v6 = vld [vmem:[#allocation5 + $0x28] sm:$0xff]   ;;  %v1671_v9 = vld [vmem:[#allocation5 + $0x30] sm:$0xff]  }
  0x4c   :  { %1466 = vmatprep.subr.bf16.mxu0 %v1666_v1  ;;  %v1681_v7 = vld [vmem:[#allocation7] sm:$0xff]   ;;  %v1682_v8 = vld [vmem:[#allocation7 + $0x8] sm:$0xff]   ;;  %v1683_v10 = vld [vmem:[#allocation7 + $0x10] sm:$0xff]  }
  0x4d   :  { %1496 = vmatprep.subr.bf16.mxu1 %v1681_v7  ;;  %v1672_v11 = vld [vmem:[#allocation5 + $0x38] sm:$0xff]   ;;  %v1685_v13 = vld [vmem:[#allocation7 + $0x20] sm:$0xff]   ;;  %v1964_v14 = vld [vmem:[#allocation2 + $0x8] sm:$0xff]  }
  0x4e   :  { %1497 = vmatpush3.bf16.msra.mxu1 %v1681_v7  ;;  %v1684_v12 = vld [vmem:[#allocation7 + $0x18] sm:$0xff]   ;;  %v1966_v15 = vld [vmem:[#allocation2 + $0x10] sm:$0xff]   ;;  %v1686_v16 = vld [vmem:[#allocation7 + $0x28] sm:$0xff]  }
  0x4f   :  { %1467 = vmatpush3.bf16.msra.mxu0 %v1666_v1  ;;  %1498 = vmatprep.subr.bf16.mxu1 %v1682_v8  ;;  %v1687_v17 = vld [vmem:[#allocation7 + $0x30] sm:$0xff]   ;;  %v1970_v18 = vld [vmem:[#allocation2 + $0x18] sm:$0xff]   ;;  %v1972_v19 = vld [vmem:[#allocation2 + $0x20] sm:$0xff]  }
  0x50   :  { %1468 = vmatprep.subr.bf16.mxu0 %v1667_v2  ;;  %v1976_v20 = vld [vmem:[#allocation2 + $0x28] sm:$0xff]   ;;  %v1978_v21 = vld [vmem:[#allocation2 + $0x30] sm:$0xff]   ;;  %v1982_v22 = vld [vmem:[#allocation2 + $0x38] sm:$0xff]  }
  0x51   :  { %v1688_v23 = vld [vmem:[#allocation7 + $0x38] sm:$0xff]   ;;  %v1689_v24 = vld [vmem:[#allocation8] sm:$0xff]   ;;  %v1690_v25 = vld [vmem:[#allocation8 + $0x8] sm:$0xff]  }
  0x52   :  { %1499 = vmatpush3.bf16.msra.mxu1 %v1682_v8  ;;  %v1691_v26 = vld [vmem:[#allocation8 + $0x10] sm:$0xff]   ;;  %v1692_v27 = vld [vmem:[#allocation8 + $0x18] sm:$0xff]   ;;  %v1693_v28 = vld [vmem:[#allocation8 + $0x20] sm:$0xff]  }
  0x53   :  { %1469 = vmatpush3.bf16.msra.mxu0 %v1667_v2  ;;  %1500 = vmatprep.subr.bf16.mxu1 %v1683_v10  ;;  %v1694_v53 = vld [vmem:[#allocation8 + $0x28] sm:$0xff]   ;;  %v1695_v54 = vld [vmem:[#allocation8 + $0x30] sm:$0xff]   ;;  %v1696_v55 = vld [vmem:[#allocation8 + $0x38] sm:$0xff]  }
  0x54   :  { %1470 = vmatprep.subr.bf16.mxu0 %v1668_v3  ;;  %v1989_v56 = vld [vmem:[%s2497_s3] ss:$0 sm:$0xff] }
  0x55   :  { %v1994_v58 = vld [vmem:[%s2498_s4] ss:$0 sm:$0xff] }
  0x56   :  { %1501 = vmatpush3.bf16.msra.mxu1 %v1683_v10  ;;  %v2001_v63 = vld [vmem:[%s2499_s5] ss:$0 sm:$0xff] }
  0x57   :  { %1471 = vmatpush3.bf16.msra.mxu0 %v1668_v3  ;;  %1502 = vmatprep.subr.bf16.mxu1 %v1684_v12 }
  0x58   :  { %1472 = vmatprep.subr.bf16.mxu0 %v1669_v5 }
  0x5a   :  { %1503 = vmatpush3.bf16.msra.mxu1 %v1684_v12 }
  0x5b   :  { %1473 = vmatpush3.bf16.msra.mxu0 %v1669_v5  ;;  %1504 = vmatprep.subr.bf16.mxu1 %v1685_v13 }
  0x5c   :  { %1474 = vmatprep.subr.bf16.mxu0 %v1670_v6 }
  0x5e   :  { %1505 = vmatpush3.bf16.msra.mxu1 %v1685_v13 }
  0x5f   :  { %1475 = vmatpush3.bf16.msra.mxu0 %v1670_v6  ;;  %1506 = vmatprep.subr.bf16.mxu1 %v1686_v16 }
  0x60   :  { %1476 = vmatprep.subr.bf16.mxu0 %v1671_v9 }
  0x62   :  { %1507 = vmatpush3.bf16.msra.mxu1 %v1686_v16 }
  0x63   :  { %1477 = vmatpush3.bf16.msra.mxu0 %v1671_v9  ;;  %1508 = vmatprep.subr.bf16.mxu1 %v1687_v17 }
  0x64   :  { %1478 = vmatprep.subr.bf16.mxu0 %v1672_v11 }
  0x66   :  { %1509 = vmatpush3.bf16.msra.mxu1 %v1687_v17 }
  0x67   :  { %1479 = vmatpush3.bf16.msra.mxu0 %v1672_v11  ;;  %1510 = vmatprep.subr.bf16.mxu1 %v1688_v23 }
  0x68   :  { %1528 = vmatprep.subr.bf16.mxu0 %v1689_v24 }
  0x6a   :  { %1481 = vmatmul.mubr.bf16.vlgmr.msra.gmra.mrb[0].mxu0 %v1964_v14  ;;  %1511 = vmatpush3.bf16.msra.mxu1 %v1688_v23 }
  0x6b   :  { %1484 = vmatprep.mubr.bf16.mxu0 %v1966_v15  ;;  %1529 = vmatpush3.bf16.msra.mxu0 %v1689_v24 }
  0x6c   :  { %1530 = vmatprep.subr.bf16.mxu0 %v1690_v25 }
  0x6f   :  { %1531 = vmatpush3.bf16.msra.mxu0 %v1690_v25 }
  0x70   :  { %1532 = vmatprep.subr.bf16.mxu0 %v1691_v26 }
  0x72   :  { %1485 = vmatmul.mubr.bf16.gmra.mrb[4].mxu0 %v1970_v18 }
  0x73   :  { %1488 = vmatprep.mubr.bf16.mxu0 %v1972_v19  ;;  %1533 = vmatpush3.bf16.msra.mxu0 %v1691_v26 }
  0x74   :  { %1534 = vmatprep.subr.bf16.mxu0 %v1692_v27 }
  0x77   :  { %1535 = vmatpush3.bf16.msra.mxu0 %v1692_v27 }
  0x78   :  { %1536 = vmatprep.subr.bf16.mxu0 %v1693_v28 }
  0x7a   :  { %1489 = vmatmul.mubr.bf16.gmra.mrb[8].mxu0 %v1976_v20 }
  0x7b   :  { %1492 = vmatprep.mubr.bf16.mxu0 %v1978_v21  ;;  %1537 = vmatpush3.bf16.msra.mxu0 %v1693_v28 }
  0x7c   :  { %1538 = vmatprep.subr.bf16.mxu0 %v1694_v53 }
  0x7f   :  { %1539 = vmatpush3.bf16.msra.mxu0 %v1694_v53 }
  0x80   :  { %1540 = vmatprep.subr.bf16.mxu0 %v1695_v54 }
  0x82   :  { %1493 = vmatmul.mubr.bf16.gmra.mrb[12].mxu0 %v1982_v22 }
  0x83   :  { %1541 = vmatpush3.bf16.msra.mxu0 %v1695_v54 }
  0x84   :  { %1542 = vmatprep.subr.bf16.mxu0 %v1696_v55 }
  0x87   :  { %1543 = vmatpush3.bf16.msra.mxu0 %v1696_v55 }
 0x13d   :  { %v1482_v29 = vpop.f32.mrb[0].mxu0 }
 0x13e   :  { %v256_v30 = vpop.f32.mrb[1].mxu0 }
 0x13f   :  { %v1483_v31 = vpop.f32.mrb[2].mxu0 }
 0x140   :  { %v320_v32 = vpack.c.bf16 %v1483_v31, %v1482_v29  ;;  %v259_v33 = vpop.f32.mrb[3].mxu0 }
 0x141   :  { %v319_v34 = vpack.c.bf16 %v259_v33, %v256_v30 }
 0x143   :  { %1512 = vmatprep.mubr.bf16.mxu1 %v319_v34 }
 0x144   :  { %1513 = vmatmul.mubr.bf16.vlgmr.msra.gmra.mrb[0].mxu1 %v320_v32 }
 0x145   :  { %v1486_v35 = vpop.f32.mrb[4].mxu0 }
 0x146   :  { %v272_v36 = vpop.f32.mrb[5].mxu0 }
 0x147   :  { %v1487_v37 = vpop.f32.mrb[6].mxu0 }
 0x148   :  { %v322_v38 = vpack.c.bf16 %v1487_v37, %v1486_v35  ;;  %v275_v39 = vpop.f32.mrb[7].mxu0 }
 0x149   :  { %v321_v40 = vpack.c.bf16 %v275_v39, %v272_v36 }
 0x14b   :  { %1516 = vmatprep.mubr.bf16.mxu1 %v321_v40 }
 0x14c   :  { %1517 = vmatmul.mubr.bf16.gmra.mrb[4].mxu1 %v322_v38 }
 0x14d   :  { %v1490_v41 = vpop.f32.mrb[8].mxu0 }
 0x14e   :  { %v288_v42 = vpop.f32.mrb[9].mxu0 }
 0x14f   :  { %v1491_v43 = vpop.f32.mrb[10].mxu0 }
 0x150   :  { %v324_v44 = vpack.c.bf16 %v1491_v43, %v1490_v41  ;;  %v291_v45 = vpop.f32.mrb[11].mxu0 }
 0x151   :  { %v323_v46 = vpack.c.bf16 %v291_v45, %v288_v42 }
 0x153   :  { %1520 = vmatprep.mubr.bf16.mxu1 %v323_v46 }
 0x154   :  { %1521 = vmatmul.mubr.bf16.gmra.mrb[8].mxu1 %v324_v44 }
 0x155   :  { %v1494_v47 = vpop.f32.mrb[12].mxu0 }
 0x156   :  { %v304_v48 = vpop.f32.mrb[13].mxu0 }
 0x157   :  { %v1495_v49 = vpop.f32.mrb[14].mxu0 }
 0x158   :  { %v326_v50 = vpack.c.bf16 %v1495_v49, %v1494_v47  ;;  %v307_v51 = vpop.f32.mrb[15].mxu0 }
 0x159   :  { %v325_v52 = vpack.c.bf16 %v307_v51, %v304_v48 }
 0x15b   :  { %1524 = vmatprep.mubr.bf16.mxu1 %v325_v52 }
 0x15c   :  { %1525 = vmatmul.mubr.bf16.gmra.mrb[12].mxu1 %v326_v50 }
 0x15d   :  { %1576 = vmatprep.mubr.bf16.mxu1 %v1961_v4 }
 0x217   :  { %v1514_v57 = vpop.f32.mrb[0].mxu1 }
 0x218   :  { %v441_v59 = vadd.f32 %v1514_v57, %v1989_v56  ;;  %v432_v60 = vpop.f32.mrb[1].mxu1 }
 0x219   :  { %v433_v61 = vadd.f32 %v1989_v56, %v432_v60  ;;  %v1515_v62 = vpop.f32.mrb[2].mxu1 }
 0x21a   :  { %v505_v0 = vmul.f32 %v1994_v58, %v441_v59  ;;  %v444_v1 = vadd.f32 %v1515_v62, %v1989_v56  ;;  %v435_v2 = vpop.f32.mrb[3].mxu1 }
 0x21b   :  { %v503_v3 = vmul.f32 %v1994_v58, %v433_v61  ;;  %v436_v5 = vadd.f32 %v1989_v56, %v435_v2 }
 0x21c   :  { %v506_v6 = vmul.f32 %v1994_v58, %v444_v1  ;;  %v2013_v9 = vadd.f32 %v2001_v63, %v505_v0 }
 0x21d   :  { %v2009_v7 = vadd.f32 %v2001_v63, %v503_v3  ;;  %v504_v8 = vmul.f32 %v1994_v58, %v436_v5 }
 0x21e   :  { %v2016_v10 = vadd.f32 %v2001_v63, %v506_v6  ;;  %v543_v27 = vmax.f32 %v2013_v9, 0.0 }
 0x21f   :  { %v2019_v11 = vadd.f32 %v2001_v63, %v504_v8  ;;  %v1518_v12 = vpop.f32.mrb[4].mxu1  ;;  %v541_v23 = vmax.f32 %v2009_v7, 0.0 }
 0x220   :  { %v544_v13 = vmax.f32 %v2016_v10, 0.0  ;;  %v457_v16 = vadd.f32 %v1518_v12, %v1989_v56  ;;  %v448_v17 = vpop.f32.mrb[5].mxu1 }
 0x221   :  { %v542_v24 = vmax.f32 %v2019_v11, 0.0  ;;  %v449_v25 = vadd.f32 %v1989_v56, %v448_v17  ;;  %v1519_v26 = vpop.f32.mrb[6].mxu1 }
 0x222   :  { %v509_v28 = vmul.f32 %v1994_v58, %v457_v16  ;;  %v460_v29 = vadd.f32 %v1519_v26, %v1989_v56  ;;  %v451_v30 = vpop.f32.mrb[7].mxu1  ;;  %v558_v34 = vpack.c.bf16 %v544_v13, %v543_v27 }
 0x223   :  { %v507_v31 = vmul.f32 %v1994_v58, %v449_v25  ;;  %v452_v32 = vadd.f32 %v1989_v56, %v451_v30  ;;  %v557_v33 = vpack.c.bf16 %v542_v24, %v541_v23 }
 0x224   :  { %v510_v35 = vmul.f32 %v1994_v58, %v460_v29  ;;  %v2045_v38 = vadd.f32 %v2001_v63, %v509_v28 }
 0x225   :  { %v2041_v36 = vadd.f32 %v2001_v63, %v507_v31  ;;  %v508_v37 = vmul.f32 %v1994_v58, %v452_v32  ;;  %1544 = vmatprep.mubr.bf16.mxu0 %v557_v33 }
 0x226   :  { %v2048_v39 = vadd.f32 %v2001_v63, %v510_v35  ;;  %1545 = vmatmul.mubr.bf16.vlgmr.msra.gmra.mrb[16].mxu0 %v558_v34  ;;  %v547_v49 = vmax.f32 %v2045_v38, 0.0 }
 0x227   :  { %v2051_v40 = vadd.f32 %v2001_v63, %v508_v37  ;;  %v1522_v41 = vpop.f32.mrb[8].mxu1  ;;  %v2518_v45 = vmax.f32 %v2041_v36, 0.0 }
 0x228   :  { %v2516_v42 = vmax.f32 %v2048_v39, 0.0  ;;  %v473_v43 = vadd.f32 %v1522_v41, %v1989_v56  ;;  %v464_v44 = vpop.f32.mrb[9].mxu1 }
 0x229   :  { %v2514_v46 = vmax.f32 %v2051_v40, 0.0  ;;  %v465_v47 = vadd.f32 %v1989_v56, %v464_v44  ;;  %v1523_v48 = vpop.f32.mrb[10].mxu1 }
 0x22a   :  { %v513_v50 = vmul.f32 %v1994_v58, %v473_v43  ;;  %v476_v51 = vadd.f32 %v1523_v48, %v1989_v56  ;;  %v467_v52 = vpop.f32.mrb[11].mxu1  ;;  %v560_v59 = vpack.c.bf16 %v2516_v42, %v547_v49 }
 0x22b   :  { %v511_v53 = vmul.f32 %v1994_v58, %v465_v47  ;;  %v468_v54 = vadd.f32 %v1989_v56, %v467_v52  ;;  %v559_v55 = vpack.c.bf16 %v2514_v46, %v2518_v45  ;;  %v1698_v52 = vld [vmem:[#allocation8 + $0x48] sm:$0xff]  }
 0x22c   :  { %v514_v57 = vmul.f32 %v1994_v58, %v476_v51  ;;  %v2077_v62 = vadd.f32 %v2001_v63, %v513_v50 }
 0x22d   :  { %v2073_v60 = vadd.f32 %v2001_v63, %v511_v53  ;;  %v512_v61 = vmul.f32 %v1994_v58, %v468_v54  ;;  %1548 = vmatprep.mubr.bf16.mxu0 %v559_v55  ;;  %v1699_v53 = vld [vmem:[#allocation8 + $0x50] sm:$0xff]   ;;  %v1700_v54 = vld [vmem:[#allocation8 + $0x58] sm:$0xff]   ;;  %v1701_v55 = vld [vmem:[#allocation8 + $0x60] sm:$0xff]  }
 0x22e   :  { %v2080_v0 = vadd.f32 %v2001_v63, %v514_v57  ;;  %1549 = vmatmul.mubr.bf16.gmra.mrb[20].mxu0 %v560_v59  ;;  %v2512_v25 = vmax.f32 %v2077_v62, 0.0 }
 0x22f   :  { %v2083_v1 = vadd.f32 %v2001_v63, %v512_v61  ;;  %v1526_v2 = vpop.f32.mrb[12].mxu1  ;;  %v2511_v8 = vmax.f32 %v2073_v60, 0.0 }
 0x230   :  { %v2510_v3 = vmax.f32 %v2080_v0, 0.0  ;;  %v489_v5 = vadd.f32 %v1526_v2, %v1989_v56  ;;  %v480_v6 = vpop.f32.mrb[13].mxu1 }
 0x231   :  { %v2509_v12 = vmax.f32 %v2083_v1, 0.0  ;;  %v481_v16 = vadd.f32 %v1989_v56, %v480_v6  ;;  %v1527_v17 = vpop.f32.mrb[14].mxu1 }
 0x232   :  { %v517_v26 = vmul.f32 %v1994_v58, %v489_v5  ;;  %v492_v28 = vadd.f32 %v1527_v17, %v1989_v56  ;;  %v483_v29 = vpop.f32.mrb[15].mxu1  ;;  %v562_v34 = vpack.c.bf16 %v2510_v3, %v2512_v25 }
 0x233   :  { %v515_v30 = vmul.f32 %v1994_v58, %v481_v16  ;;  %v484_v31 = vadd.f32 %v1989_v56, %v483_v29  ;;  %v561_v32 = vpack.c.bf16 %v2509_v12, %v2511_v8 }
 0x234   :  { %v518_v33 = vmul.f32 %v1994_v58, %v492_v28  ;;  %v2109_v56 = vadd.f32 %v2001_v63, %v517_v26 }
 0x235   :  { %v2105_v35 = vadd.f32 %v2001_v63, %v515_v30  ;;  %v516_v37 = vmul.f32 %v1994_v58, %v484_v31  ;;  %1552 = vmatprep.mubr.bf16.mxu0 %v561_v32 }
 0x236   :  { %v2112_v41 = vadd.f32 %v2001_v63, %v518_v33  ;;  %1553 = vmatmul.mubr.bf16.gmra.mrb[24].mxu0 %v562_v34  ;;  %v2508_v50 = vmax.f32 %v2109_v56, 0.0 }
 0x237   :  { %v2115_v43 = vadd.f32 %v2001_v63, %v516_v37  ;;  %v2507_v47 = vmax.f32 %v2105_v35, 0.0  ;;  %v1697_v63 = vld [vmem:[#allocation8 + $0x40] sm:$0xff]  }
 0x238   :  { %v2506_v44 = vmax.f32 %v2112_v41, 0.0  ;;  %1592 = vmatprep.subr.bf16.mxu0 %v1697_v63 }
 0x239   :  { %v2505_v48 = vmax.f32 %v2115_v43, 0.0  ;;  %1593 = vmatpush3.bf16.msra.mxu0 %v1697_v63 }
 0x23a   :  { %v564_v51 = vpack.c.bf16 %v2506_v44, %v2508_v50  ;;  %1594 = vmatprep.subr.bf16.mxu0 %v1698_v52 }
 0x23b   :  { %v563_v58 = vpack.c.bf16 %v2505_v48, %v2507_v47 }
 0x23d   :  { %1556 = vmatprep.mubr.bf16.mxu0 %v563_v58  ;;  %1595 = vmatpush3.bf16.msra.mxu0 %v1698_v52 }
 0x23e   :  { %1557 = vmatmul.mubr.bf16.gmra.mrb[28].mxu0 %v564_v51  ;;  %1596 = vmatprep.subr.bf16.mxu0 %v1699_v53 }
 0x241   :  { %1597 = vmatpush3.bf16.msra.mxu0 %v1699_v53 }
 0x242   :  { %1598 = vmatprep.subr.bf16.mxu0 %v1700_v54 }
 0x245   :  { %1599 = vmatpush3.bf16.msra.mxu0 %v1700_v54 }
 0x246   :  { %1600 = vmatprep.subr.bf16.mxu0 %v1701_v55 }
 0x249   :  { %1601 = vmatpush3.bf16.msra.mxu0 %v1701_v55 }
 0x2f9   :  { %v1546_v57 = vpop.f32.mrb[16].mxu0 }
 0x2fa   :  { %v663_v59 = vpop.f32.mrb[17].mxu0 }
 0x2fb   :  { %v1547_v61 = vpop.f32.mrb[18].mxu0 }
 0x2fc   :  { %v727_v2 = vpack.c.bf16 %v1547_v61, %v1546_v57  ;;  %v666_v5 = vpop.f32.mrb[19].mxu0  ;;  %v1702_v57 = vld [vmem:[#allocation8 + $0x68] sm:$0xff]   ;;  %v1704_v61 = vld [vmem:[#allocation8 + $0x78] sm:$0xff]  }
 0x2fd   :  { %v726_v6 = vpack.c.bf16 %v666_v5, %v663_v59  ;;  %1602 = vmatprep.subr.bf16.mxu0 %v1702_v57  ;;  %v1703_v59 = vld [vmem:[#allocation8 + $0x70] sm:$0xff]  }
 0x2fe   :  { %1603 = vmatpush3.bf16.msra.mxu0 %v1702_v57 }
 0x2ff   :  { %1560 = vmatprep.subr.bf16.mxu1 %v726_v6  ;;  %1604 = vmatprep.subr.bf16.mxu0 %v1703_v59 }
 0x300   :  { %1561 = vmatpush3.bf16.msra.mxu1 %v726_v6  ;;  %v2145_v6 = vld [vmem:[%s2502_s8] ss:$0 sm:$0xff] }
 0x301   :  { %v1550_v16 = vpop.f32.mrb[20].mxu0  ;;  %1562 = vmatprep.subr.bf16.mxu1 %v727_v2 }
 0x302   :  { %v679_v17 = vpop.f32.mrb[21].mxu0  ;;  %1605 = vmatpush3.bf16.msra.mxu0 %v1703_v59 }
 0x303   :  { %v1551_v26 = vpop.f32.mrb[22].mxu0  ;;  %1606 = vmatprep.subr.bf16.mxu0 %v1704_v61 }
 0x304   :  { %v729_v28 = vpack.c.bf16 %v1551_v26, %v1550_v16  ;;  %v682_v29 = vpop.f32.mrb[23].mxu0  ;;  %1563 = vmatpush3.bf16.msra.mxu1 %v727_v2  ;;  %v2140_v2 = vld [vmem:[%s2501_s7] ss:$0 sm:$0xff] }
 0x305   :  { %v728_v30 = vpack.c.bf16 %v682_v29, %v679_v17  ;;  %v2151_v17 = vld [vmem:[%s2503_s9] ss:$0 sm:$0xff] }
 0x306   :  { %1607 = vmatpush3.bf16.msra.mxu0 %v1704_v61 }
 0x307   :  { %1564 = vmatprep.subr.bf16.mxu1 %v728_v30 }
 0x308   :  { %1565 = vmatpush3.bf16.msra.mxu1 %v728_v30 }
 0x309   :  { %v1554_v31 = vpop.f32.mrb[24].mxu0  ;;  %1566 = vmatprep.subr.bf16.mxu1 %v729_v28 }
 0x30a   :  { %v695_v32 = vpop.f32.mrb[25].mxu0 }
 0x30b   :  { %v1555_v33 = vpop.f32.mrb[26].mxu0 }
 0x30c   :  { %v731_v34 = vpack.c.bf16 %v1555_v33, %v1554_v31  ;;  %v698_v37 = vpop.f32.mrb[27].mxu0  ;;  %1567 = vmatpush3.bf16.msra.mxu1 %v729_v28 }
 0x30d   :  { %v730_v58 = vpack.c.bf16 %v698_v37, %v695_v32 }
 0x30f   :  { %1568 = vmatprep.subr.bf16.mxu1 %v730_v58 }
 0x310   :  { %1569 = vmatpush3.bf16.msra.mxu1 %v730_v58 }
 0x311   :  { %v1558_v51 = vpop.f32.mrb[28].mxu0  ;;  %1570 = vmatprep.subr.bf16.mxu1 %v731_v34 }
 0x312   :  { %v711_v63 = vpop.f32.mrb[29].mxu0 }
 0x313   :  { %v1559_v52 = vpop.f32.mrb[30].mxu0 }
 0x314   :  { %v733_v53 = vpack.c.bf16 %v1559_v52, %v1558_v51  ;;  %v714_v54 = vpop.f32.mrb[31].mxu0  ;;  %1571 = vmatpush3.bf16.msra.mxu1 %v731_v34 }
 0x315   :  { %v732_v55 = vpack.c.bf16 %v714_v54, %v711_v63 }
 0x317   :  { %1572 = vmatprep.subr.bf16.mxu1 %v732_v55 }
 0x318   :  { %1573 = vmatpush3.bf16.msra.mxu1 %v732_v55 }
 0x319   :  { %1574 = vmatprep.subr.bf16.mxu1 %v733_v53 }
 0x31c   :  { %1575 = vmatpush3.bf16.msra.mxu1 %v733_v53 }
 0x31f   :  { %1577 = vmatmul.mubr.bf16.vlgmr.msra.gmra.mrb[16].mxu1 %v1964_v14 }
 0x320   :  { %1580 = vmatprep.mubr.bf16.mxu1 %v1966_v15 }
 0x327   :  { %1581 = vmatmul.mubr.bf16.gmra.mrb[20].mxu1 %v1970_v18 }
 0x328   :  { %1584 = vmatprep.mubr.bf16.mxu1 %v1972_v19 }
 0x32f   :  { %1585 = vmatmul.mubr.bf16.gmra.mrb[24].mxu1 %v1976_v20 }
 0x330   :  { %1588 = vmatprep.mubr.bf16.mxu1 %v1978_v21 }
 0x337   :  { %1589 = vmatmul.mubr.bf16.gmra.mrb[28].mxu1 %v1982_v22 }
 0x338   :  { %1640 = vmatprep.mubr.bf16.mxu1 %v1961_v4 }
 0x3f2   :  { %v1578_v5 = vpop.f32.mrb[16].mxu1 }
 0x3f3   :  { %v784_v4 = vadd.f32 %v1578_v5, %v2140_v2  ;;  %v775_v16 = vpop.f32.mrb[17].mxu1 }
 0x3f4   :  { %v776_v26 = vadd.f32 %v2140_v2, %v775_v16  ;;  %v1579_v28 = vpop.f32.mrb[18].mxu1 }
 0x3f5   :  { %v848_v29 = vmul.f32 %v2145_v6, %v784_v4  ;;  %v787_v30 = vadd.f32 %v1579_v28, %v2140_v2  ;;  %v778_v31 = vpop.f32.mrb[19].mxu1 }
 0x3f6   :  { %v846_v32 = vmul.f32 %v2145_v6, %v776_v26  ;;  %v779_v33 = vadd.f32 %v2140_v2, %v778_v31 }
 0x3f7   :  { %v2159_v34 = vadd.f32 %v2151_v17, %v848_v29  ;;  %v849_v37 = vmul.f32 %v2145_v6, %v787_v30 }
 0x3f8   :  { %v2163_v58 = vadd.f32 %v2151_v17, %v846_v32  ;;  %v847_v51 = vmul.f32 %v2145_v6, %v779_v33 }
 0x3f9   :  { %v2167_v63 = vadd.f32 %v2151_v17, %v849_v37  ;;  %v886_v54 = vmax.f32 %v2159_v34, 0.0 }
 0x3fa   :  { %v2170_v52 = vadd.f32 %v2151_v17, %v847_v51  ;;  %v1582_v53 = vpop.f32.mrb[20].mxu1  ;;  %v884_v61 = vmax.f32 %v2163_v58, 0.0 }
 0x3fb   :  { %v887_v55 = vmax.f32 %v2167_v63, 0.0  ;;  %v800_v57 = vadd.f32 %v1582_v53, %v2140_v2  ;;  %v791_v59 = vpop.f32.mrb[21].mxu1 }
 0x3fc   :  { %v885_v5 = vmax.f32 %v2170_v52, 0.0  ;;  %v792_v4 = vadd.f32 %v2140_v2, %v791_v59  ;;  %v1583_v16 = vpop.f32.mrb[22].mxu1 }
 0x3fd   :  { %v918_v26 = vpack.c.bf16 %v887_v55, %v886_v54  ;;  %v852_v28 = vmul.f32 %v2145_v6, %v800_v57  ;;  %v803_v29 = vadd.f32 %v1583_v16, %v2140_v2  ;;  %v794_v30 = vpop.f32.mrb[23].mxu1 }
 0x3fe   :  { %v850_v31 = vmul.f32 %v2145_v6, %v792_v4  ;;  %v795_v32 = vadd.f32 %v2140_v2, %v794_v30  ;;  %v917_v33 = vpack.c.bf16 %v885_v5, %v884_v61 }
 0x3ff   :  { %v2191_v37 = vadd.f32 %v2151_v17, %v852_v28  ;;  %v853_v51 = vmul.f32 %v2145_v6, %v803_v29 }
 0x400   :  { %v2195_v53 = vadd.f32 %v2151_v17, %v850_v31  ;;  %v851_v57 = vmul.f32 %v2145_v6, %v795_v32  ;;  %1608 = vmatprep.mubr.bf16.mxu0 %v917_v33 }
 0x401   :  { %v2199_v59 = vadd.f32 %v2151_v17, %v853_v51  ;;  %1609 = vmatmul.mubr.bf16.vlgmr.msra.gmra.mrb[32].mxu0 %v918_v26  ;;  %v2525_v30 = vmax.f32 %v2191_v37, 0.0 }
 0x402   :  { %v2202_v4 = vadd.f32 %v2151_v17, %v851_v57  ;;  %v1586_v16 = vpop.f32.mrb[24].mxu1  ;;  %v2517_v31 = vmax.f32 %v2195_v53, 0.0 }
 0x403   :  { %v2515_v28 = vmax.f32 %v2199_v59, 0.0  ;;  %v816_v29 = vadd.f32 %v1586_v16, %v2140_v2  ;;  %v807_v48 = vpop.f32.mrb[25].mxu1 }
 0x404   :  { %v2513_v32 = vmax.f32 %v2202_v4, 0.0  ;;  %v808_v33 = vadd.f32 %v2140_v2, %v807_v48  ;;  %v1587_v51 = vpop.f32.mrb[26].mxu1 }
 0x405   :  { %v856_v26 = vmul.f32 %v2145_v6, %v816_v29  ;;  %v819_v57 = vadd.f32 %v1587_v51, %v2140_v2  ;;  %v810_v44 = vpop.f32.mrb[27].mxu1  ;;  %v920_v47 = vpack.c.bf16 %v2515_v28, %v2525_v30 }
 0x406   :  { %v854_v16 = vmul.f32 %v2145_v6, %v808_v33  ;;  %v811_v50 = vadd.f32 %v2140_v2, %v810_v44  ;;  %v919_v48 = vpack.c.bf16 %v2513_v32, %v2517_v31 }
 0x407   :  { %v2223_v12 = vadd.f32 %v2151_v17, %v856_v26  ;;  %v857_v29 = vmul.f32 %v2145_v6, %v819_v57 }
 0x408   :  { %v2227_v51 = vadd.f32 %v2151_v17, %v854_v16  ;;  %v855_v3 = vmul.f32 %v2145_v6, %v811_v50  ;;  %1612 = vmatprep.mubr.bf16.mxu0 %v919_v48 }
 0x409   :  { %v2231_v33 = vadd.f32 %v2151_v17, %v857_v29  ;;  %1613 = vmatmul.mubr.bf16.gmra.mrb[36].mxu0 %v920_v47  ;;  %v2522_v25 = vmax.f32 %v2223_v12, 0.0 }
 0x40a   :  { %v2234_v44 = vadd.f32 %v2151_v17, %v855_v3  ;;  %v1590_v8 = vpop.f32.mrb[28].mxu1  ;;  %v2521_v16 = vmax.f32 %v2227_v51, 0.0 }
 0x40b   :  { %v2520_v26 = vmax.f32 %v2231_v33, 0.0  ;;  %v832_v57 = vadd.f32 %v1590_v8, %v2140_v2  ;;  %v823_v32 = vpop.f32.mrb[29].mxu1 }
 0x40c   :  { %v2519_v50 = vmax.f32 %v2234_v44, 0.0  ;;  %v824_v48 = vadd.f32 %v2140_v2, %v823_v32  ;;  %v1591_v29 = vpop.f32.mrb[30].mxu1 }
 0x40d   :  { %v860_v47 = vmul.f32 %v2145_v6, %v832_v57  ;;  %v835_v3 = vadd.f32 %v1591_v29, %v2140_v2  ;;  %v826_v46 = vpop.f32.mrb[31].mxu1  ;;  %v922_v28 = vpack.c.bf16 %v2520_v26, %v2522_v25 }
 0x40e   :  { %v858_v8 = vmul.f32 %v2145_v6, %v824_v48  ;;  %v827_v42 = vadd.f32 %v2140_v2, %v826_v46  ;;  %v921_v32 = vpack.c.bf16 %v2519_v50, %v2521_v16 }
 0x40f   :  { %v2255_v31 = vadd.f32 %v2151_v17, %v860_v47  ;;  %v861_v57 = vmul.f32 %v2145_v6, %v835_v3 }
 0x410   :  { %v2259_v29 = vadd.f32 %v2151_v17, %v858_v8  ;;  %v859_v45 = vmul.f32 %v2145_v6, %v827_v42  ;;  %1616 = vmatprep.mubr.bf16.mxu0 %v921_v32 }
 0x411   :  { %v2263_v48 = vadd.f32 %v2151_v17, %v861_v57  ;;  %1617 = vmatmul.mubr.bf16.gmra.mrb[40].mxu0 %v922_v28  ;;  %v2524_v2 = vmax.f32 %v2255_v31, 0.0 }
 0x412   :  { %v2266_v46 = vadd.f32 %v2151_v17, %v859_v45  ;;  %v2527_v50 = vmax.f32 %v2259_v29, 0.0 }
 0x413   :  { %v2523_v47 = vmax.f32 %v2263_v48, 0.0 }
 0x414   :  { %v2526_v3 = vmax.f32 %v2266_v46, 0.0 }
 0x415   :  { %v924_v42 = vpack.c.bf16 %v2523_v47, %v2524_v2 }
 0x416   :  { %v923_v6 = vpack.c.bf16 %v2526_v3, %v2527_v50 }
 0x418   :  { %1620 = vmatprep.mubr.bf16.mxu0 %v923_v6 }
 0x419   :  { %1621 = vmatmul.mubr.bf16.gmra.mrb[44].mxu0 %v924_v42 }
 0x4d4   :  { %v1610_v45 = vpop.f32.mrb[32].mxu0 }
 0x4d5   :  { %v1024_v17 = vpop.f32.mrb[33].mxu0 }
 0x4d6   :  { %v1611_v28 = vpop.f32.mrb[34].mxu0 }
 0x4d7   :  { %v1088_v8 = vpack.c.bf16 %v1611_v28, %v1610_v45  ;;  %v1027_v32 = vpop.f32.mrb[35].mxu0 }
 0x4d8   :  { %v1087_v57 = vpack.c.bf16 %v1027_v32, %v1024_v17 }
 0x4da   :  { %1624 = vmatprep.subr.bf16.mxu1 %v1087_v57 }
 0x4db   :  { %1625 = vmatpush3.bf16.msra.mxu1 %v1087_v57 }
 0x4dc   :  { %v1614_v26 = vpop.f32.mrb[36].mxu0  ;;  %1626 = vmatprep.subr.bf16.mxu1 %v1088_v8 }
 0x4dd   :  { %v1040_v16 = vpop.f32.mrb[37].mxu0 }
 0x4de   :  { %v1615_v25 = vpop.f32.mrb[38].mxu0 }
 0x4df   :  { %v1090_v47 = vpack.c.bf16 %v1615_v25, %v1614_v26  ;;  %v1043_v2 = vpop.f32.mrb[39].mxu0  ;;  %1627 = vmatpush3.bf16.msra.mxu1 %v1088_v8 }
 0x4e0   :  { %v1089_v30 = vpack.c.bf16 %v1043_v2, %v1040_v16 }
 0x4e2   :  { %1628 = vmatprep.subr.bf16.mxu1 %v1089_v30 }
 0x4e3   :  { %1629 = vmatpush3.bf16.msra.mxu1 %v1089_v30  ;;  %v108_v30 = vlaneseq }
 0x4e4   :  { %v1618_v6 = vpop.f32.mrb[40].mxu0  ;;  %1630 = vmatprep.subr.bf16.mxu1 %v1090_v47 }
 0x4e5   :  { %v1056_v42 = vpop.f32.mrb[41].mxu0 }
 0x4e6   :  { %v1619_v3 = vpop.f32.mrb[42].mxu0 }
 0x4e7   :  { %v1092_v50 = vpack.c.bf16 %v1619_v3, %v1618_v6  ;;  %v1059_v45 = vpop.f32.mrb[43].mxu0  ;;  %1631 = vmatpush3.bf16.msra.mxu1 %v1090_v47 }
 0x4e8   :  { %v1091_v17 = vpack.c.bf16 %v1059_v45, %v1056_v42 }
 0x4ea   :  { %1632 = vmatprep.subr.bf16.mxu1 %v1091_v17 }
 0x4eb   :  { %1633 = vmatpush3.bf16.msra.mxu1 %v1091_v17 }
 0x4ec   :  { %v1622_v28 = vpop.f32.mrb[44].mxu0  ;;  %1634 = vmatprep.subr.bf16.mxu1 %v1092_v50 }
 0x4ed   :  { %v1072_v32 = vpop.f32.mrb[45].mxu0 }
 0x4ee   :  { %v1623_v57 = vpop.f32.mrb[46].mxu0 }
 0x4ef   :  { %v1094_v25 = vpack.c.bf16 %v1623_v57, %v1622_v28  ;;  %v1075_v26 = vpop.f32.mrb[47].mxu0  ;;  %1635 = vmatpush3.bf16.msra.mxu1 %v1092_v50  ;;  %v2290_v50 = vld [vmem:[%s2501_s7 + $0x1] ss:$0 sm:$0xff]  ;;  %s1829_s7 = smov [#allocation10]  }
 0x4f0   :  { %v1093_v16 = vpack.c.bf16 %v1075_v26, %v1072_v32 }
 0x4f2   :  { %1636 = vmatprep.subr.bf16.mxu1 %v1093_v16 }
 0x4f3   :  { %1637 = vmatpush3.bf16.msra.mxu1 %v1093_v16 }
 0x4f4   :  { %1638 = vmatprep.subr.bf16.mxu1 %v1094_v25 }
 0x4f7   :  { %1639 = vmatpush3.bf16.msra.mxu1 %v1094_v25 }
 0x4fa   :  { %1641 = vmatmul.mubr.bf16.vlgmr.msra.gmra.mrb[32].mxu1 %v1964_v14  ;;  %v2295_v14 = vld [vmem:[%s2502_s8 + $0x1] ss:$0 sm:$0xff]  ;;  %s1302_s8 = sshll.u32 %s1829_s7, 4  ;;  %s1303_s8 = int_to_ptr.vmem [resolvable:$true] %s1302_s8 }
 0x4fb   :  { %1644 = vmatprep.mubr.bf16.mxu1 %v1966_v15  ;;  %v2297_v15 = vand.u32 127, %v108_v30  ;;  %p1798_p5 = scmp.lt.s32.totalorder %s1303_s8, %s1303_s8 }
 0x4fd   :  { %vm900_vm0 = vcmp.ge.s32.totalorder %v2297_v15, 16  ;;  %vm1264_vm1 = vcmp.ge.s32.totalorder %v2297_v15, 32 }
 0x4fe   :  { %v903_v26 = vsel %vm900_vm0, %v886_v54, %v543_v27  ;;  %v904_v27 = vsel %vm900_vm0, %v887_v55, %v544_v13  ;;  %v902_v10 = vsel %vm900_vm0, %v885_v5, %v542_v24 }
 0x502   :  { %1645 = vmatmul.mubr.bf16.gmra.mrb[36].mxu1 %v1970_v18 }
 0x503   :  { %1648 = vmatprep.mubr.bf16.mxu1 %v1972_v19 }
 0x50a   :  { %1649 = vmatmul.mubr.bf16.gmra.mrb[40].mxu1 %v1976_v20  ;;  %v2303_v20 = vld [vmem:[%s2503_s9 + $0x1] ss:$0 sm:$0xff]  ;;  %s1793_s9 = scalar_lea.vmem %s1303_s8, 2048 }
 0x50b   :  { %1652 = vmatprep.mubr.bf16.mxu1 %v1978_v21  ;;  %p1794_p4 = scmp.ne.s32.totalorder %s1303_s8, %s1793_s9  ;;  %p1799_p6 = scmp.lt.s32.totalorder %s1793_s9, %s1793_s9 }
 0x50d   :  { %p1800_p7 = por %p1799_p6, %p1798_p5 }
 0x50f   :  { %p1801_p8 = pnand %p1800_p7, %p1794_p4 }
 0x512   :  { %1653 = vmatmul.mubr.bf16.gmra.mrb[44].mxu1 %v1982_v22 }
 0x5cd   :  { %v1642_v2 = vpop.f32.mrb[32].mxu1 }
 0x5ce   :  { %v1146_v18 = vadd.f32 %v1642_v2, %v2290_v50  ;;  %v1137_v19 = vpop.f32.mrb[33].mxu1 }
 0x5cf   :  { %v1138_v21 = vadd.f32 %v2290_v50, %v1137_v19  ;;  %v1643_v22 = vpop.f32.mrb[34].mxu1 }
 0x5d0   :  { %v1212_v47 = vmul.f32 %v2295_v14, %v1146_v18  ;;  %v1149_v3 = vadd.f32 %v1643_v22, %v2290_v50  ;;  %v1140_v8 = vpop.f32.mrb[35].mxu1  ;;  %v901_v18 = vsel %vm900_vm0, %v884_v61, %v541_v23 }
 0x5d1   :  { %v1210_v6 = vmul.f32 %v2295_v14, %v1138_v21  ;;  %v1141_v42 = vadd.f32 %v2290_v50, %v1140_v8 }
 0x5d2   :  { %v1234_v45 = vadd.f32 %v2303_v20, %v1212_v47  ;;  %v1213_v17 = vmul.f32 %v2295_v14, %v1149_v3 }
 0x5d3   :  { %v1232_v28 = vadd.f32 %v2303_v20, %v1210_v6  ;;  %v1211_v32 = vmul.f32 %v2295_v14, %v1141_v42  ;;  %v2528_v42 = vmax.f32 %v2191_v37, 0.0 }
 0x5d4   :  { %v1250_v57 = vmax.f32 %v1234_v45, 0.0  ;;  %v1235_v25 = vadd.f32 %v2303_v20, %v1213_v17 }
 0x5d5   :  { %v1248_v16 = vmax.f32 %v1232_v28, 0.0  ;;  %v1233_v30 = vadd.f32 %v2303_v20, %v1211_v32  ;;  %v1646_v2 = vpop.f32.mrb[36].mxu1  ;;  %v907_v45 = vsel %vm900_vm0, %v2528_v42, %v547_v49  ;;  %v2531_v49 = vmax.f32 %v2048_v39, 0.0 }
 0x5d6   :  { %v1267_v19 = vsel %vm1264_vm1, %v1250_v57, %v903_v26  ;;  %v1251_v9 = vmax.f32 %v1235_v25, 0.0  ;;  %v1162_v34 = vadd.f32 %v1646_v2, %v2290_v50  ;;  %v1153_v21 = vpop.f32.mrb[37].mxu1  ;;  %v2529_v57 = vmax.f32 %v2041_v36, 0.0 }
 0x5d7   :  { %1283 = vst [vmem:[#allocation10 + $0x10] sm:$0xff] %v1267_v19  ;;  %v1265_v7 = vsel %vm1264_vm1, %v1248_v16, %v901_v18  ;;  %v1249_v58 = vmax.f32 %v1233_v30, 0.0  ;;  %v1154_v23 = vadd.f32 %v2290_v50, %v1153_v21  ;;  %v1647_v54 = vpop.f32.mrb[38].mxu1  ;;  %v2530_v25 = vmax.f32 %v2195_v53, 0.0 }
 0x5d8   :  { %1281 = vst [vmem:[#allocation10] sm:$0xff] %v1265_v7  ;;  %v1268_v63 = vsel %vm1264_vm1, %v1251_v9, %v904_v27  ;;  %v1216_v13 = vmul.f32 %v2295_v14, %v1162_v34  ;;  %v1165_v55 = vadd.f32 %v1647_v54, %v2290_v50  ;;  %v1156_v61 = vpop.f32.mrb[39].mxu1  ;;  %v2532_v2 = vmax.f32 %v2199_v59, 0.0 }
 0x5d9   :  { %1284 = vst [vmem:[#allocation10 + $0x18] sm:$0xff] %v1268_v63  ;;  %v1266_v22 = vsel %vm1264_vm1, %v1249_v58, %v902_v10  ;;  %v1214_v11 = vmul.f32 %v2295_v14, %v1154_v23  ;;  %v1157_v52 = vadd.f32 %v2290_v50, %v1156_v61  ;;  %v905_v26 = vsel %vm900_vm0, %v2530_v25, %v2529_v57 }
 0x5da   :  { %1282 = vst [vmem:[#allocation10 + $0x8] sm:$0xff] %v1266_v22  ;;  %v1238_v24 = vadd.f32 %v2303_v20, %v1216_v13  ;;  %v1217_v5 = vmul.f32 %v2295_v14, %v1165_v55  ;;  %v908_v18 = vsel %vm900_vm0, %v2532_v2, %v2531_v49  ;;  %v2533_v34 = vmax.f32 %v2051_v40, 0.0 }
 0x5db   :  { %v1236_v47 = vadd.f32 %v2303_v20, %v1214_v11  ;;  %v1215_v3 = vmul.f32 %v2295_v14, %v1157_v52  ;;  %v2534_v21 = vmax.f32 %v2202_v4, 0.0  ;;  %v2535_v22 = vmax.f32 %v2077_v62, 0.0 }
 0x5dc   :  { %v1254_v8 = vmax.f32 %v1238_v24, 0.0  ;;  %v1239_v6 = vadd.f32 %v2303_v20, %v1217_v5  ;;  %v2536_v11 = vmax.f32 %v2223_v12, 0.0 }
 0x5dd   :  { %v1252_v17 = vmax.f32 %v1236_v47, 0.0  ;;  %v1237_v28 = vadd.f32 %v2303_v20, %v1215_v3  ;;  %v1650_v32 = vpop.f32.mrb[40].mxu1  ;;  %v906_v39 = vsel %vm900_vm0, %v2534_v21, %v2533_v34  ;;  %v2537_v3 = vmax.f32 %v2073_v60, 0.0 }
 0x5de   :  { %v1271_v16 = vsel %vm1264_vm1, %v1254_v8, %v907_v45  ;;  %v1255_v38 = vmax.f32 %v1239_v6, 0.0  ;;  %v1178_v37 = vadd.f32 %v1650_v32, %v2290_v50  ;;  %v1169_v30 = vpop.f32.mrb[41].mxu1  ;;  %v911_v52 = vsel %vm900_vm0, %v2536_v11, %v2535_v22 }
 0x5df   :  { %1287 = vst [vmem:[#allocation10 + $0x30] sm:$0xff] %v1271_v16  ;;  %v1269_v36 = vsel %vm1264_vm1, %v1252_v17, %v905_v26  ;;  %v1253_v53 = vmax.f32 %v1237_v28, 0.0  ;;  %v1170_v19 = vadd.f32 %v2290_v50, %v1169_v30  ;;  %v1651_v9 = vpop.f32.mrb[42].mxu1  ;;  %v2538_v8 = vmax.f32 %v2227_v51, 0.0 }
 0x5e0   :  { %1285 = vst [vmem:[#allocation10 + $0x20] sm:$0xff] %v1269_v36  ;;  %v1272_v59 = vsel %vm1264_vm1, %v1255_v38, %v908_v18  ;;  %v1220_v27 = vmul.f32 %v2295_v14, %v1178_v37  ;;  %v1181_v7 = vadd.f32 %v1651_v9, %v2290_v50  ;;  %v1172_v58 = vpop.f32.mrb[43].mxu1  ;;  %v2539_v17 = vmax.f32 %v2080_v0, 0.0 }
 0x5e1   :  { %1288 = vst [vmem:[#allocation10 + $0x38] sm:$0xff] %v1272_v59  ;;  %v1270_v23 = vsel %vm1264_vm1, %v1253_v53, %v906_v39  ;;  %v1218_v40 = vmul.f32 %v2295_v14, %v1170_v19  ;;  %v1173_v4 = vadd.f32 %v2290_v50, %v1172_v58  ;;  %v909_v6 = vsel %vm900_vm0, %v2538_v8, %v2537_v3 }
 0x5e2   :  { %1286 = vst [vmem:[#allocation10 + $0x28] sm:$0xff] %v1270_v23  ;;  %v1242_v54 = vadd.f32 %v2303_v20, %v1220_v27  ;;  %v1221_v10 = vmul.f32 %v2295_v14, %v1181_v7  ;;  %v2540_v28 = vmax.f32 %v2231_v33, 0.0  ;;  %v2541_v26 = vmax.f32 %v2083_v1, 0.0 }
 0x5e3   :  { %v1240_v63 = vadd.f32 %v2303_v20, %v1218_v40  ;;  %v1219_v13 = vmul.f32 %v2295_v14, %v1173_v4  ;;  %v2542_v16 = vmax.f32 %v2234_v44, 0.0  ;;  %v2543_v34 = vmax.f32 %v2109_v56, 0.0 }
 0x5e4   :  { %v1258_v55 = vmax.f32 %v1242_v54, 0.0  ;;  %v1243_v61 = vadd.f32 %v2303_v20, %v1221_v10  ;;  %v912_v32 = vsel %vm900_vm0, %v2540_v28, %v2539_v17  ;;  %v2544_v21 = vmax.f32 %v2255_v31, 0.0 }
 0x5e5   :  { %v1256_v24 = vmax.f32 %v1240_v63, 0.0  ;;  %v1241_v5 = vadd.f32 %v2303_v20, %v1219_v13  ;;  %v1654_v47 = vpop.f32.mrb[44].mxu1  ;;  %v910_v0 = vsel %vm900_vm0, %v2542_v16, %v2541_v26  ;;  %v2545_v27 = vmax.f32 %v2105_v35, 0.0 }
 0x5e6   :  { %v1275_v42 = vsel %vm1264_vm1, %v1258_v55, %v911_v52  ;;  %v1259_v62 = vmax.f32 %v1243_v61, 0.0  ;;  %v1194_v12 = vadd.f32 %v1654_v47, %v2290_v50  ;;  %v1185_v45 = vpop.f32.mrb[45].mxu1  ;;  %v2546_v7 = vmax.f32 %v2259_v29, 0.0 }
 0x5e7   :  { %1291 = vst [vmem:[#allocation10 + $0x50] sm:$0xff] %v1275_v42  ;;  %v1273_v60 = vsel %vm1264_vm1, %v1256_v24, %v909_v6  ;;  %v1257_v51 = vmax.f32 %v1241_v5, 0.0  ;;  %v1186_v57 = vadd.f32 %v2290_v50, %v1185_v45  ;;  %v1655_v25 = vpop.f32.mrb[46].mxu1  ;;  %v2547_v56 = vmax.f32 %v2112_v41, 0.0 }
 0x5e8   :  { %1289 = vst [vmem:[#allocation10 + $0x40] sm:$0xff] %v1273_v60  ;;  %v1276_v33 = vsel %vm1264_vm1, %v1259_v62, %v912_v32  ;;  %v1224_v38 = vmul.f32 %v2295_v14, %v1194_v12  ;;  %v1197_v37 = vadd.f32 %v1655_v25, %v2290_v50  ;;  %v1188_v30 = vpop.f32.mrb[47].mxu1  ;;  %v2548_v31 = vmax.f32 %v2263_v48, 0.0 }
 0x5e9   :  { %1292 = vst [vmem:[#allocation10 + $0x58] sm:$0xff] %v1276_v33  ;;  %v1274_v49 = vsel %vm1264_vm1, %v1257_v51, %v910_v0  ;;  %v1222_v1 = vmul.f32 %v2295_v14, %v1186_v57  ;;  %v1189_v44 = vadd.f32 %v2290_v50, %v1188_v30  ;;  %v915_v50 = vsel %vm900_vm0, %v2544_v21, %v2543_v34 }
 0x5ea   :  { %1290 = vst [vmem:[#allocation10 + $0x48] sm:$0xff] %v1274_v49  ;;  %v1246_v2 = vadd.f32 %v2303_v20, %v1224_v38  ;;  %v1225_v18 = vmul.f32 %v2295_v14, %v1197_v37  ;;  %v916_v40 = vsel %vm900_vm0, %v2548_v31, %v2547_v56  ;;  %v2549_v29 = vmax.f32 %v2115_v43, 0.0 }
 0x5eb   :  { %v1244_v36 = vadd.f32 %v2303_v20, %v1222_v1  ;;  %v1223_v53 = vmul.f32 %v2295_v14, %v1189_v44  ;;  %v913_v14 = vsel %vm900_vm0, %v2546_v7, %v2545_v27  ;;  %v2550_v4 = vmax.f32 %v2266_v46, 0.0 }
 0x5ec   :  { %v1262_v19 = vmax.f32 %v1246_v2, 0.0  ;;  %v1247_v9 = vadd.f32 %v2303_v20, %v1225_v18 }
 0x5ed   :  { %v1260_v39 = vmax.f32 %v1244_v36, 0.0  ;;  %v1245_v59 = vadd.f32 %v2303_v20, %v1223_v53  ;;  %v914_v54 = vsel %vm900_vm0, %v2550_v4, %v2549_v29 }
 0x5ee   :  { %v1279_v58 = vsel %vm1264_vm1, %v1262_v19, %v915_v50  ;;  %v1263_v23 = vmax.f32 %v1247_v9, 0.0 }
 0x5ef   :  { %1295 = vst [vmem:[#allocation10 + $0x70] sm:$0xff] %v1279_v58  ;;  %v1277_v35 = vsel %vm1264_vm1, %v1260_v39, %v913_v14  ;;  %v1261_v20 = vmax.f32 %v1245_v59, 0.0 }
 0x5f0   :  { %1293 = vst [vmem:[#allocation10 + $0x60] sm:$0xff] %v1277_v35  ;;  %v1280_v41 = vsel %vm1264_vm1, %v1263_v23, %v916_v40 }
 0x5f1   :  { %1296 = vst [vmem:[#allocation10 + $0x78] sm:$0xff] %v1280_v41  ;;  %v1278_v48 = vsel %vm1264_vm1, %v1261_v20, %v914_v54 }
 0x5f2   :  { %1294 = vst [vmem:[#allocation10 + $0x68] sm:$0xff] %v1278_v48 }
 0x5f3   :  { %1804 = shalt.err (!%p1801_p8)
}
 0x5f4   :  { %s1805_s18 = scalar_lea.hbm %s2504_s10, 2048 }
 0x5f5   :  { %p1806_p9 = scmp.ne.s32.totalorder %s2504_s10, %s1805_s18  ;;  %p1809_p10 = scmp.lt.u32.totalorder %s1805_s18, %s2504_s10 }
 0x5f7   :  { %p1811_p11 = pnand %p1809_p10, %p1806_p9 }
 0x5f9   :  { %1814 = shalt.err (!%p1811_p11)
}
 0x5fa   :  { %s1830_s2 = smov 128   ;;  %s1831_s20 = smov 8  }
 0x5fb   :  { %1308 = dma.vmem_to_hbm [thread:$0]  %s1303_s8, 2048, %s2504_s10, [#allocation4], %s1830_s2, %s1830_s2, %s1831_s20  }
 0x5fc   :  { %1821 = dma.done.wait [#allocation4], 2048  }
 0x5fd   :  { %1822 = vsyncadd [#allocation4], 4294965248 }
 0x5fe   :  { %1312 = vsyncpa [#allocation3], 1 }
 0x5ff   :  { %1313 = vsyncpa [#allocation6], 1 }
 0x600   :  { %1314 = vsyncpa [#allocation9], 1 }
 0x601   :  { %1315 = vsyncpa [#allocation4], 1 }

</bundles_post_ra>
